<compile_context>
chip_gen: v6e
topology: v6e:2x2x1
jax: 0.10.0
libtpu: 0.0.40
codegen_flags: <defaults>
</compile_context>

<pallas_src>
import functools

import jax
import jax.numpy as jnp
from jax.experimental import pallas as pl
from jax.experimental.pallas import tpu as pltpu


_MAX_DISP = 192             # upper bound on (non-negative) disparity for the warp loop
_K1_BLOCK_BYTES = 1 << 18   # ~256 KiB per (TR, W) f32 stream block in kernel 1
_K2_MAX_ROWS = 2048         # kernel-2 row tile: 2048 x 128 x 4 B = 1 MiB / stream / buffer


def _ceil_to(x, m):
    return ((x + m - 1) // m) * m


def _cdiv(a, b):
    return -(-a // b)


# ----------------------------------------------------------------------------
# Kernel 1: Resample1d warp + occlusion mask + horizontal half of 3x3 dilation
# ----------------------------------------------------------------------------
def _warp_occ_kernel(left_ref, right_ref, hmax_ref, warp_ref, src_ref, *, max_disp):
    """For one (batch, row-tile):
         left_warp[h, x] = bilinear 1-D sample of right[h, x - left[h, x]]
                           (zero outside the image, like Resample1dFunction)
         occ             = (|left_warp - left| <= 1).float()
         hmax            = horizontal 3-max of occ with implicit pad value 1.0
                           (vertical half of the separable 3x3 max-pool is done
                            outside the kernel: row tiles have no row halo).
    """
    left = left_ref[0]          # (TR, W) disparity (non-negative)
    right = right_ref[0]        # (TR, W)
    TR, W = left.shape

    col = jax.lax.broadcasted_iota(jnp.int32, (TR, W), 1)
    coords = col.astype(jnp.float32) - left         # sample coordinate
    c0f = jnp.floor(coords)
    frac = coords - c0f
    c0 = c0f.astype(jnp.int32)

    # ---- loop invariants, hoisted out of the shift loop ----------------------
    d0 = col - c0                                   # shift supplying the floor tap
    w0 = jnp.where(c0 >= 0, 1.0 - frac, 0.0)        # floor tap weight (0 outside image)
    w1 = jnp.where(c0 + 1 >= 0, frac, 0.0)          # ceil  tap weight (0 outside image)

    # ---- runtime-bounded trip count: d0 == ceil(left), so max ceil(left) covers all taps
    dmax = jnp.clip(jnp.max(jnp.ceil(left)), 0.0, float(max_disp))
    niter = jnp.ceil((dmax + 1.0) * 0.5).astype(jnp.int32)     # 2 shifts / iteration

    warp_ref[...] = jnp.zeros_like(left)
    src_ref[...] = right                            # right rolled by the current shift

    @pl.loop(0, niter)
    def _(i):
        s = i * 2
        src = src_ref[...]                          # == roll(right, 2*i)
        m0 = d0 == s
        m1 = d0 == s + 1
        m2 = d0 == s + 2
        acc = warp_ref[...] + (jnp.where(m0, w0, 0.0) + jnp.where(m1, w1, 0.0)) * src
        src = pltpu.roll(src, shift=1, axis=1)      # == roll(right, 2*i + 1)
        warp_ref[...] = acc + (jnp.where(m1, w0, 0.0) + jnp.where(m2, w1, 0.0)) * src
        src_ref[...] = pltpu.roll(src, shift=1, axis=1)

    warp = warp_ref[...]
    occ = (jnp.abs(warp - left) <= 1.0).astype(jnp.float32)

    # horizontal 3-max with pad value 1.0 (pad dominates at the column borders)
    hmax = jnp.maximum(occ, jnp.maximum(pltpu.roll(occ, shift=1, axis=1),
                                        pltpu.roll(occ, shift=W - 1, axis=1)))
    border_col = (col == 0) | (col == W - 1)
    hmax_ref[0] = jnp.where(border_col, 1.0, hmax)


def warp_occmask(left, right, max_disp=None):
    """left, right: (B, H, W) f32 -> dilated occlusion-mask GT (B, H, W) f32."""
    B, H, W = left.shape
    if max_disp is None:
        max_disp = min(W - 1, _MAX_DISP)

    # row tile: ~_K1_BLOCK_BYTES per (TR, W) f32 stream block, multiple of 8 sublanes
    cap = max(8, (_K1_BLOCK_BYTES // (4 * W)) // 8 * 8)
    TR = min(_ceil_to(H, 8), cap)
    Hp = _ceil_to(H, TR)
    if Hp != H:                          # padded rows are sliced off again below
        pad = ((0, 0), (0, Hp - H), (0, 0))
        left = jnp.pad(left, pad)
        right = jnp.pad(right, pad)
    NT = Hp // TR

    blk = pl.BlockSpec((1, TR, W), lambda b, t: (b, t, 0))
    kern = functools.partial(_warp_occ_kernel, max_disp=max_disp)
    hmax = pl.pallas_call(
        kern,
        out_shape=jax.ShapeDtypeStruct((B, Hp, W), jnp.float32),
        grid=(B, NT),
        in_specs=[blk, blk],
        out_specs=blk,
        scratch_shapes=[pltpu.VMEM((TR, W), jnp.float32),    # warp accumulator
                        pltpu.VMEM((TR, W), jnp.float32)],   # rolled right
        compiler_params=pltpu.CompilerParams(
            dimension_semantics=("parallel", "parallel")),
    )(left, right)
    hmax = hmax[:, :H, :]

    # vertical half of the separable 3x3 max-pool (pad value 1.0 at top/bottom).
    # Tiny JAX second pass because row tiles have no +-1-row halo.
    ones = jnp.ones((B, 1, W), jnp.float32)
    up = jnp.concatenate([ones, hmax[:, :-1, :]], axis=1)
    dn = jnp.concatenate([hmax[:, 1:, :], ones], axis=1)
    return jnp.maximum(hmax, jnp.maximum(up, dn))


# ----------------------------------------------------------------------------
# Kernel 2: fused per-scale losses + elementwise outputs (lane-dense layout)
# ----------------------------------------------------------------------------
def _scale_loss_kernel(disp_ref, logit_ref, dgt_ref, ogt_ref,
                       occ_est_ref, occ_err_ref, disp_err_ref,
                       l1_ref, bce_ref, *, n_valid):
    d = disp_ref[...]       # (TR, 128) disparity estimate
    x = logit_ref[...]      # occlusion-mask logits
    g = dgt_ref[...]        # disparity ground truth
    z = ogt_ref[...]        # occlusion-mask GT

    TR, C = d.shape
    t = pl.program_id(0)
    row = jax.lax.broadcasted_iota(jnp.int32, (TR, C), 0)
    col = jax.lax.broadcasted_iota(jnp.int32, (TR, C), 1)
    valid = ((t * TR + row) * C + col < n_valid).astype(jnp.float32)

    # shared transcendental for sigmoid + BCE-with-logits
    e = jnp.exp(-jnp.abs(x))
    one_p = 1.0 + e
    inv = 1.0 / one_p
    sig = jnp.where(x >= 0.0, inv, e * inv)         # numerically stable sigmoid
    occ_est_ref[...] = sig
    occ_err_ref[...] = jnp.abs(sig - z)

    abs_d = jnp.abs(d - g)
    disp_err_ref[...] = abs_d

    # numerically stable BCE-with-logits: max(x,0) - x*z + log(1 + exp(-|x|))
    bce = jnp.maximum(x, 0.0) - x * z + jnp.log(one_p)

    # per-tile partial sums (padding masked out); means are taken in the wrapper
    l1_ref[...] = jnp.sum(abs_d * valid).reshape(1, 1, 1)
    bce_ref[...] = jnp.sum(bce * valid).reshape(1, 1, 1)


def scale_losses(disp_est, occ_logit, disp_gt, occ_gt):
    """Inputs (B, H, W) f32 -> (occ_est, occ_err, disp_err, l1_mean, bce_mean)."""
    B, H, W = disp_est.shape
    n = B * H * W

    # lane-dense relayout: flatten everything (batch included) to rows of 128
    # lanes, pad to a whole number of row tiles; padding is masked in the sums.
    C = 128
    R = _cdiv(n, C)
    R8 = _ceil_to(R, 8)
    NT = _cdiv(R8, _K2_MAX_ROWS)
    TR = _ceil_to(_cdiv(R8, NT), 8)
    Rp = TR * NT
    npad = Rp * C

    def prep(t):
        flat = jnp.reshape(t, (-1,))
        return jnp.pad(flat, (0, npad - n)).reshape(Rp, C)

    args = tuple(prep(t) for t in (disp_est, occ_logit, disp_gt, occ_gt))

    img = pl.BlockSpec((TR, C), lambda t: (t, 0))
    acc = pl.BlockSpec((1, 1, 1), lambda t: (t, 0, 0))
    kern = functools.partial(_scale_loss_kernel, n_valid=n)

    occ_est, occ_err, disp_err, l1_p, bce_p = pl.pallas_call(
        kern,
        out_shape=(jax.ShapeDtypeStruct((Rp, C), jnp.float32),
                   jax.ShapeDtypeStruct((Rp, C), jnp.float32),
                   jax.ShapeDtypeStruct((Rp, C), jnp.float32),
                   jax.ShapeDtypeStruct((NT, 1, 1), jnp.float32),
                   jax.ShapeDtypeStruct((NT, 1, 1), jnp.float32)),
        grid=(NT,),
        in_specs=[img, img, img, img],
        out_specs=(img, img, img, acc, acc),
        compiler_params=pltpu.CompilerParams(dimension_semantics=("parallel",)),
    )(*args)

    back = lambda t: t.reshape(-1)[:n].reshape(B, H, W)
    l1_mean = jnp.sum(l1_p) / (20.0 * n)     # mean(|d/20 - g/20|) = sum(|d-g|) / (20*n)
    bce_mean = jnp.sum(bce_p) / n
    return back(occ_est), back(occ_err), back(disp_err), l1_mean, bce_mean


# ----------------------------------------------------------------------------
# Pyramid helpers (cheap glue, plain JAX)
# TODO(synk): generate_max_pyramid / generate_pyramid are external helpers in
# the original repo; assumed here to be repeated 2x2 stride-2 max / avg pooling
# (requires H, W divisible by 2**(nscales-1)).
# ----------------------------------------------------------------------------
def _max_pool2x2(x):
    B, H, W = x.shape
    return jnp.max(x.reshape(B, H // 2, 2, W // 2, 2), axis=(2, 4))


def _avg_pool2x2(x):
    B, H, W = x.shape
    return jnp.mean(x.reshape(B, H // 2, 2, W // 2, 2), axis=(2, 4))


def generate_max_pyramid(x, nscales):
    outs = [x]
    for _ in range(nscales - 1):
        outs.append(_max_pool2x2(outs[-1]))
    return outs


def generate_pyramid(x, nscales):
    outs = [x]
    for _ in range(nscales - 1):
        outs.append(_avg_pool2x2(outs[-1]))
    return outs


# ----------------------------------------------------------------------------
# Forward pass (mirrors StereoSupervisedWithOccmaskLoss.forward)
# ----------------------------------------------------------------------------
def stereo_supervised_with_occmask_loss(disp_ests, occmask_logits, left_gt, right_gt):
    nscales = len(disp_ests)
    sq = lambda t: jnp.squeeze(t, axis=1).astype(jnp.float32)  # NCHW -> (B,H,W)
    uq = lambda t: t[:, None, :, :]                            # (B,H,W) -> NCHW

    left = sq(left_gt)
    right = sq(right_gt)

    occmask_gt = warp_occmask(left, right)

    left_gts = generate_max_pyramid(left, nscales)
    occmask_gts = generate_pyramid(occmask_gt, nscales)

    l1_loss = jnp.float32(0.0)
    occmask_loss = jnp.float32(0.0)
    occ_ests, occ_errs, disp_errs = [], [], []
    for i in range(nscales):
        occ_est, occ_err, disp_err, l1_mean, bce_mean = scale_losses(
            sq(disp_ests[i]), sq(occmask_logits[i]), left_gts[i], occmask_gts[i])
        l1_loss = l1_loss + l1_mean / (2 ** i)
        occmask_loss = occmask_loss + bce_mean / (2 ** i)
        occ_ests.append(uq(occ_est))
        occ_errs.append(uq(occ_err))
        disp_errs.append(uq(disp_err))

    total_loss = l1_loss + occmask_loss
    scalar_outputs = {'total_loss': total_loss,
                      'occmask_loss': occmask_loss,
                      'l1_loss': l1_loss}
    image_outputs = {'left_occmask_est': occ_ests,
                     'left_disp_est': list(disp_ests),
                     'left_occmask_error': occ_errs,
                     'left_disp_error': disp_errs,
                     'left_occmask_gt': [uq(t) for t in occmask_gts],
                     'left_disp_gt': [uq(t) for t in left_gts]}
    return total_loss, scalar_outputs, image_outputs


# ----------------------------------------------------------------------------
if __name__ == "__main__":
    # Module has no learnable parameters; inputs are the only tensors needed.
    key = jax.random.PRNGKey(0)
    B, C, H, W = 2, 1, 16, 16
    nscales = 3

    k1, k2, k3, k4 = jax.random.split(key, 4)
    left_gt = jax.random.uniform(k1, (B, C, H, W), jnp.float32, 0.0, 6.0)
    right_gt = jax.random.uniform(k2, (B, C, H, W), jnp.float32, 0.0, 6.0)

    dkeys = jax.random.split(k3, nscales)
    okeys = jax.random.split(k4, nscales)
    disp_ests, occmask_logits = [], []
    for i in range(nscales):
        h, w = H // (2 ** i), W // (2 ** i)
        disp_ests.append(
            jax.random.uniform(dkeys[i], (B, C, h, w), jnp.float32, 0.0, 6.0))
        occmask_logits.append(
            jax.random.normal(okeys[i], (B, C, h, w), jnp.float32))

    total, scalars, images = stereo_supervised_with_occmask_loss(
        disp_ests, occmask_logits, left_gt, right_gt)
    jax.block_until_ready((total, scalars, images))
    print("KERNEL_OK")
</pallas_src>

<mosaic_0001>
module attributes {stable_mosaic.version = 11 : i64} {
  func.func @_warp_occ_kernel(%arg0: i32, %arg1: i32, %arg2: memref<1x16x16xf32, #tpu.memory_space<vmem>>, %arg3: memref<1x16x16xf32, #tpu.memory_space<vmem>>, %arg4: memref<1x16x16xf32, #tpu.memory_space<vmem>>, %arg5: memref<16x16xf32, #tpu.memory_space<vmem>>, %arg6: memref<16x16xf32, #tpu.memory_space<vmem>>) attributes {dimension_semantics = [#tpu.dimension_semantics<parallel>, #tpu.dimension_semantics<parallel>], iteration_bounds = array<i64: 2, 1>, scalar_prefetch = 0 : i64, scratch_operands = 2 : i64, tpu.core_type = #tpu.core_type<tc>, window_params = [{transform_indices = @transform_0, window_bounds = array<i64: 1, 16, 16>}, {transform_indices = @transform_1, window_bounds = array<i64: 1, 16, 16>}, {transform_indices = @transform_2, window_bounds = array<i64: 1, 16, 16>}]} {
    %c0 = arith.constant 0 : index
    %c0_0 = arith.constant 0 : index
    %c0_1 = arith.constant 0 : index
    %0 = vector.load %arg2[%c0, %c0_0, %c0_1] : memref<1x16x16xf32, #tpu.memory_space<vmem>>, vector<1x16x16xf32>
    %1 = vector.shape_cast %0 : vector<1x16x16xf32> to vector<16x16xf32>
    %c0_2 = arith.constant 0 : index
    %c0_3 = arith.constant 0 : index
    %c0_4 = arith.constant 0 : index
    %2 = vector.load %arg3[%c0_2, %c0_3, %c0_4] : memref<1x16x16xf32, #tpu.memory_space<vmem>>, vector<1x16x16xf32>
    %3 = vector.shape_cast %2 : vector<1x16x16xf32> to vector<16x16xf32>
    %4 = tpu.iota {dimensions = array<i32: 1>} : vector<16x16xi32>
    %5 = arith.sitofp %4 : vector<16x16xi32> to vector<16x16xf32>
    %6 = arith.subf %5, %1 : vector<16x16xf32>
    %7 = math.floor %6 : vector<16x16xf32>
    %8 = arith.subf %6, %7 : vector<16x16xf32>
    %9 = arith.fptosi %7 : vector<16x16xf32> to vector<16x16xi32>
    %10 = arith.subi %4, %9 : vector<16x16xi32>
    %c0_i32 = arith.constant 0 : i32
    %11 = vector.broadcast %c0_i32 : i32 to vector<16x16xi32>
    %12 = arith.cmpi sge, %9, %11 : vector<16x16xi32>
    %cst = arith.constant 1.000000e+00 : f32
    %13 = vector.broadcast %cst : f32 to vector<16x16xf32>
    %14 = arith.subf %13, %8 : vector<16x16xf32>
    %cst_5 = arith.constant 0.000000e+00 : f32
    %15 = vector.broadcast %cst_5 : f32 to vector<16x16xf32>
    %16 = arith.select %12, %14, %15 : vector<16x16xi1>, vector<16x16xf32>
    %c1_i32 = arith.constant 1 : i32
    %17 = vector.broadcast %c1_i32 : i32 to vector<16x16xi32>
    %18 = arith.addi %9, %17 : vector<16x16xi32>
    %c0_i32_6 = arith.constant 0 : i32
    %19 = vector.broadcast %c0_i32_6 : i32 to vector<16x16xi32>
    %20 = arith.cmpi sge, %18, %19 : vector<16x16xi32>
    %cst_7 = arith.constant 0.000000e+00 : f32
    %21 = vector.broadcast %cst_7 : f32 to vector<16x16xf32>
    %22 = arith.select %20, %8, %21 : vector<16x16xi1>, vector<16x16xf32>
    %23 = math.ceil %1 : vector<16x16xf32>
    %24 = vector.shape_cast %23 : vector<16x16xf32> to vector<1x16x16xf32>
    %cst_8 = arith.constant dense<0xFF800000> : vector<1xf32>
    %25 = vector.multi_reduction <maximumf>, %24, %cst_8 [1, 2] : vector<1x16x16xf32> to vector<1xf32>
    %26 = vector.shape_cast %25 : vector<1xf32> to vector<1x1x1xf32>
    %27 = vector.extract %26[0, 0, 0] : f32 from vector<1x1x1xf32>
    %cst_9 = arith.constant 0.000000e+00 : f32
    %cst_10 = arith.constant 1.500000e+01 : f32
    %28 = arith.maximumf %cst_9, %27 : f32
    %29 = arith.minimumf %cst_10, %28 : f32
    %cst_11 = arith.constant 1.000000e+00 : f32
    %30 = arith.addf %29, %cst_11 : f32
    %cst_12 = arith.constant 5.000000e-01 : f32
    %31 = arith.mulf %30, %cst_12 : f32
    %32 = math.ceil %31 : f32
    %33 = arith.fptosi %32 : f32 to i32
    %cst_13 = arith.constant 0.000000e+00 : f32
    %34 = vector.broadcast %cst_13 : f32 to vector<16x16xf32>
    %c0_14 = arith.constant 0 : index
    %c0_15 = arith.constant 0 : index
    %35 = vector.load %arg5[%c0_14, %c0_15] : memref<16x16xf32, #tpu.memory_space<vmem>>, vector<16x16xf32>
    tpu.vector_store %arg5[%c0_14, %c0_15], %34 {strides = array<i32>} : memref<16x16xf32, #tpu.memory_space<vmem>>, vector<16x16xf32>,
    %c0_16 = arith.constant 0 : index
    %c0_17 = arith.constant 0 : index
    %36 = vector.load %arg6[%c0_16, %c0_17] : memref<16x16xf32, #tpu.memory_space<vmem>>, vector<16x16xf32>
    tpu.vector_store %arg6[%c0_16, %c0_17], %3 {strides = array<i32>} : memref<16x16xf32, #tpu.memory_space<vmem>>, vector<16x16xf32>,
    %c0_i32_18 = arith.constant 0 : i32
    %37 = arith.subi %33, %c0_i32_18 : i32
    %c1_i32_19 = arith.constant 1 : i32
    %c1_i32_20 = arith.constant 1 : i32
    %38 = arith.subi %c1_i32_19, %c1_i32_20 : i32
    %39 = arith.addi %37, %38 : i32
    %c1_i32_21 = arith.constant 1 : i32
    %40 = arith.divsi %39, %c1_i32_21 : i32
    %c1_i32_22 = arith.constant 1 : i32
    %c0_i32_23 = arith.constant 0 : i32
    %c0_i32_24 = arith.constant 0 : i32
    %41 = arith.subi %40, %c0_i32_24 : i32
    %42 = arith.addi %c0_i32_24, %41 : i32
    %c1_i32_25 = arith.constant 1 : i32
    scf.for %arg7 = %c0_i32_24 to %42 step %c1_i32_25  : i32 {
      %64 = arith.muli %arg7, %c1_i32_22 : i32
      %65 = arith.addi %c0_i32_23, %64 : i32
      %c2_i32 = arith.constant 2 : i32
      %66 = arith.muli %65, %c2_i32 : i32
      %c0_36 = arith.constant 0 : index
      %c0_37 = arith.constant 0 : index
      %67 = vector.load %arg6[%c0_36, %c0_37] : memref<16x16xf32, #tpu.memory_space<vmem>>, vector<16x16xf32>
      %68 = vector.broadcast %66 : i32 to vector<16x16xi32>
      %69 = arith.cmpi eq, %10, %68 : vector<16x16xi32>
      %c1_i32_38 = arith.constant 1 : i32
      %70 = arith.addi %66, %c1_i32_38 : i32
      %71 = vector.broadcast %70 : i32 to vector<16x16xi32>
      %72 = arith.cmpi eq, %10, %71 : vector<16x16xi32>
      %c2_i32_39 = arith.constant 2 : i32
      %73 = arith.addi %66, %c2_i32_39 : i32
      %74 = vector.broadcast %73 : i32 to vector<16x16xi32>
      %75 = arith.cmpi eq, %10, %74 : vector<16x16xi32>
      %c0_40 = arith.constant 0 : index
      %c0_41 = arith.constant 0 : index
      %76 = vector.load %arg5[%c0_40, %c0_41] : memref<16x16xf32, #tpu.memory_space<vmem>>, vector<16x16xf32>
      %cst_42 = arith.constant 0.000000e+00 : f32
      %77 = vector.broadcast %cst_42 : f32 to vector<16x16xf32>
      %78 = arith.select %69, %16, %77 : vector<16x16xi1>, vector<16x16xf32>
      %cst_43 = arith.constant 0.000000e+00 : f32
      %79 = vector.broadcast %cst_43 : f32 to vector<16x16xf32>
      %80 = arith.select %72, %22, %79 : vector<16x16xi1>, vector<16x16xf32>
      %81 = arith.addf %78, %80 : vector<16x16xf32>
      %82 = arith.mulf %81, %67 : vector<16x16xf32>
      %83 = arith.addf %76, %82 : vector<16x16xf32>
      %c1_i32_44 = arith.constant 1 : i32
      %84 = tpu.dynamic_rotate %67 by %c1_i32_44 dim 1 : vector<16x16xf32>, i32 -> vector<16x16xf32>
      %cst_45 = arith.constant 0.000000e+00 : f32
      %85 = vector.broadcast %cst_45 : f32 to vector<16x16xf32>
      %86 = arith.select %72, %16, %85 : vector<16x16xi1>, vector<16x16xf32>
      %cst_46 = arith.constant 0.000000e+00 : f32
      %87 = vector.broadcast %cst_46 : f32 to vector<16x16xf32>
      %88 = arith.select %75, %22, %87 : vector<16x16xi1>, vector<16x16xf32>
      %89 = arith.addf %86, %88 : vector<16x16xf32>
      %90 = arith.mulf %89, %84 : vector<16x16xf32>
      %91 = arith.addf %83, %90 : vector<16x16xf32>
      %c0_47 = arith.constant 0 : index
      %c0_48 = arith.constant 0 : index
      %92 = vector.load %arg5[%c0_47, %c0_48] : memref<16x16xf32, #tpu.memory_space<vmem>>, vector<16x16xf32>
      tpu.vector_store %arg5[%c0_47, %c0_48], %91 {strides = array<i32>} : memref<16x16xf32, #tpu.memory_space<vmem>>, vector<16x16xf32>,
      %c1_i32_49 = arith.constant 1 : i32
      %93 = tpu.dynamic_rotate %84 by %c1_i32_49 dim 1 : vector<16x16xf32>, i32 -> vector<16x16xf32>
      %c0_50 = arith.constant 0 : index
      %c0_51 = arith.constant 0 : index
      %94 = vector.load %arg6[%c0_50, %c0_51] : memref<16x16xf32, #tpu.memory_space<vmem>>, vector<16x16xf32>
      tpu.vector_store %arg6[%c0_50, %c0_51], %93 {strides = array<i32>} : memref<16x16xf32, #tpu.memory_space<vmem>>, vector<16x16xf32>,
    }
    %c0_26 = arith.constant 0 : index
    %c0_27 = arith.constant 0 : index
    %43 = vector.load %arg5[%c0_26, %c0_27] : memref<16x16xf32, #tpu.memory_space<vmem>>, vector<16x16xf32>
    %44 = arith.subf %43, %1 : vector<16x16xf32>
    %45 = math.absf %44 : vector<16x16xf32>
    %cst_28 = arith.constant 1.000000e+00 : f32
    %46 = vector.broadcast %cst_28 : f32 to vector<16x16xf32>
    %47 = arith.cmpf ole, %45, %46 : vector<16x16xf32>
    %48 = arith.extui %47 : vector<16x16xi1> to vector<16x16xi32>
    %49 = arith.sitofp %48 : vector<16x16xi32> to vector<16x16xf32>
    %c1_i32_29 = arith.constant 1 : i32
    %50 = tpu.dynamic_rotate %49 by %c1_i32_29 dim 1 : vector<16x16xf32>, i32 -> vector<16x16xf32>
    %c15_i32 = arith.constant 15 : i32
    %51 = tpu.dynamic_rotate %49 by %c15_i32 dim 1 : vector<16x16xf32>, i32 -> vector<16x16xf32>
    %52 = arith.maximumf %50, %51 : vector<16x16xf32>
    %53 = arith.maximumf %49, %52 : vector<16x16xf32>
    %c0_i32_30 = arith.constant 0 : i32
    %54 = vector.broadcast %c0_i32_30 : i32 to vector<16x16xi32>
    %55 = arith.cmpi eq, %4, %54 : vector<16x16xi32>
    %c15_i32_31 = arith.constant 15 : i32
    %56 = vector.broadcast %c15_i32_31 : i32 to vector<16x16xi32>
    %57 = arith.cmpi eq, %4, %56 : vector<16x16xi32>
    %58 = arith.ori %55, %57 : vector<16x16xi1>
    %cst_32 = arith.constant 1.000000e+00 : f32
    %59 = vector.broadcast %cst_32 : f32 to vector<16x16xf32>
    %60 = arith.select %58, %59, %53 : vector<16x16xi1>, vector<16x16xf32>
    %c0_33 = arith.constant 0 : index
    %c0_34 = arith.constant 0 : index
    %c0_35 = arith.constant 0 : index
    %61 = vector.load %arg4[%c0_33, %c0_34, %c0_35] : memref<1x16x16xf32, #tpu.memory_space<vmem>>, vector<1x16x16xf32>
    %62 = vector.shape_cast %61 : vector<1x16x16xf32> to vector<16x16xf32>
    %63 = vector.shape_cast %60 : vector<16x16xf32> to vector<1x16x16xf32>
    tpu.vector_store %arg4[%c0_33, %c0_34, %c0_35], %63 {strides = array<i32>} : memref<1x16x16xf32, #tpu.memory_space<vmem>>, vector<1x16x16xf32>,
    return
  }
  func.func @transform_0(%arg0: i32, %arg1: i32) -> (i32, i32, i32) {
    %c0_i32 = arith.constant 0 : i32
    %c0_i32_0 = arith.constant 0 : i32
    return %arg0, %arg1, %c0_i32 : i32, i32, i32
  }
  func.func @transform_1(%arg0: i32, %arg1: i32) -> (i32, i32, i32) {
    %c0_i32 = arith.constant 0 : i32
    %c0_i32_0 = arith.constant 0 : i32
    return %arg0, %arg1, %c0_i32 : i32, i32, i32
  }
  func.func @transform_2(%arg0: i32, %arg1: i32) -> (i32, i32, i32) {
    %c0_i32 = arith.constant 0 : i32
    %c0_i32_0 = arith.constant 0 : i32
    return %arg0, %arg1, %c0_i32 : i32, i32, i32
  }
}

</mosaic_0001>

<bundles_post_ra>
// kernel: tpu_custom_call.1
= control target key start
LH: loop header
LB: loop body
LE: loop exit
PB: predicated region body
PF: predicated region fallthrough
CT: control target
= control target key end

     0   :  { %7 = vsyncpa [#allocation5], 0  ;;  %s1158_s0 = inlined_call_operand.hbm [shape: f32[2,16,16], index: 0, kind: input, shape index: {}]   ;;  %s1159_s1 = inlined_call_operand.hbm [shape: f32[2,16,16], index: 1, kind: input, shape index: {}]   ;;  %s1160_s2 = inlined_call_operand.hbm [shape: f32[2,16,16], index: 2, kind: output, shape index: {}]  }
   0x1   :  { %9 = vsyncpa [#allocation5 + $0x1], 0 }
   0x2   :  { %10 = vsyncpa [#allocation8], 0 }
   0x3   :  { %12 = vsyncpa [#allocation8 + $0x1], 0 }
   0x4   :  { %13 = vsyncpa [#allocation6], 0 }
   0x5   :  { %15 = vsyncpa [#allocation6 + $0x1], 0  ;;  %s875_s9 = smov 0   ;;  %s877_s10 = smov 0  }
   0x6   :  { %s879_s11 = smov 0   ;;  %s881_s12 = smov 0  }
   0x7   :  { %s883_s13 = smov 0   ;;  %s885_s14 = smov 0  }
   0x8 LB: > { %s554_s15 = sadd.s32 4294967295, %s839_s14   ;;  %s555_s16 = sadd.s32 4294967294, %s839_s14   ;;  %s839_s14 = sphi %s885_s14, %s21_s14   ;;  %s835_s13 = sphi %s883_s13, %s1171_s13   ;;  %s831_s12 = sphi %s881_s12, %s1170_s12   ;;  %s827_s11 = sphi %s879_s11, %s1169_s11   ;;  %s823_s10 = sphi %s877_s10, %s1168_s10   ;;  %s819_s9 = sphi %s875_s9, %s1167_s9  }
   0x9   : > { %s33_s17 = sadd.s32 1, %s835_s13  ;;  %s42_s18 = sadd.s32 1, %s827_s11 }
   0xa   : > { %p35_p0 = scmp.ge.s32.totalorder %s33_s17, 2  ;;  %p49_p1 = scmp.ne.s32.totalorder %s827_s11, %s823_s10 }
   0xb   : > { %p50_p2 = scmp.eq.s32.totalorder %s839_s14, 0  ;;  %p55_p3 = scmp.ne.s32.totalorder %s823_s10, %s819_s9 }
   0xc   : > { %s1173_s17 = smov (%p35_p0, %s33_s17), 0  ;;  %p56_p5 = scmp.eq.s32.totalorder %s554_s15, 0 }
   0xd   : > { %p916_p4 = por %p50_p2, %p49_p1  ;;  %s37_s20 = ssub.s32 %s835_s13, %s1173_s17 }
   0xe   : > { %p109_p6 = scmp.eq.s32.totalorder %s554_s15, 1  ;;  %p40_p7 = scmp.eq.s32.totalorder %s37_s20, 0 }
   0xf   : > { %p922_p8 = por %p56_p5, %p55_p3  ;;  %p115_p10 = scmp.eq.s32.totalorder %s555_s16, 1 }
  0x10   : > { %p926_p9 = por %p109_p6, %p49_p1  ;;  %p557_p12 = scmp.ge.s32.totalorder %s839_s14, 2 }
  0x11   : > { %s931_s23 = scalar_select %p40_p7, %s827_s11, %s42_s18  }
  0x12   : > { %p933_p11 = por %p115_p10, %p55_p3  ;;  %p605_p13 = scmp.lt.s32.totalorder %s839_s14, 2 }
  0x13   : > { %s940_s25 = sand.u32 1, %s827_s11   ;;  %s577_s27 = sshll.u32 %s835_s13, 8 }
  0x14   : > { %s558_s26 = sshll.u32 %s940_s25, 4  ;;  %s147_s30 = scalar_lea.hbm %s1158_s0, %s577_s27 }
  0x15   : > { %s139_s3 = scalar_lea.vmem [#allocation4], %s558_s26  ;;  %p953_p0 = pnand %p605_p13, %p916_p4 }
  0x16   : > { %s148_s4 = sshll.u32 %s139_s3, 4  ;;  %p564_p1 = scmp.ge.s32.totalorder %s839_s14, 1  ;;  %s149_s4 = int_to_ptr.vmem [resolvable:$true] %s148_s4 }
  0x17   : > { %s136_s6 = scalar_lea.sflag [#allocation5], %s940_s25  ;;  %p697_p2 = pneg %p953_p0 }
  0x18   : > { %s708_s7 = scalar_lea.vmem %s149_s4, 256  ;;  %s845_s8 = smov [#allocation4]  }
  0x19   : > { %p709_p3 = scmp.ne.s32.totalorder %s149_s4, %s708_s7  ;;  %s713_s15 = sshll.u32 %s845_s8, 4  ;;  %s714_s15 = int_to_ptr.vmem [resolvable:$false] %s713_s15 }
  0x1a   : > { %s715_s16 = scalar_lea.vmem %s714_s15, 512  ;;  %p716_p4 = scmp.lt.s32.totalorder %s149_s4, %s714_s15 }
  0x1b   : > { %p711_p5 = pnand %p709_p3, %p697_p2  ;;  %p717_p7 = scmp.lt.s32.totalorder %s715_s16, %s708_s7 }
  0x1d   : > { %p712_p6 = pneg %p711_p5  ;;  %p718_p10 = por %p717_p7, %p716_p4 }
  0x1f   : > { %p719_p13 = pnand %p718_p10, %p712_p6 }
  0x21   : > { %722 = shalt.err (!%p719_p13)
}
  0x22   : > { %s846_s18 = smov 128   ;;  %s847_s19 = smov 8  }
  0x23   : > { %597 = dma.hbm_to_vmem [thread:$0]  (!%p953_p0), %s147_s30, 256, %s149_s4, %s136_s6, %s846_s18, %s846_s18, %s847_s19  }
  0x24   : > { %p179_p3 = scmp.lt.s32.totalorder %s839_s14, 3  ;;  %s170_s29 = scalar_lea.hbm %s1159_s1, %s577_s27 }
  0x25   : > { %s162_s7 = scalar_lea.vmem [#allocation7], %s558_s26  ;;  %s159_s15 = scalar_lea.sflag [#allocation8], %s940_s25 }
  0x26   : > { %p974_p5 = pnand %p564_p1, %p179_p3  ;;  %s171_s8 = sshll.u32 %s162_s7, 4  ;;  %s172_s8 = int_to_ptr.vmem [resolvable:$true] %s171_s8 }
  0x27   : > { %s736_s16 = scalar_lea.vmem %s172_s8, 256  ;;  %s848_s30 = smov [#allocation7]  }
  0x28   : > { %p737_p6 = scmp.ne.s32.totalorder %s172_s8, %s736_s16  ;;  %s741_s4 = sshll.u32 %s848_s30, 4  ;;  %s742_s4 = int_to_ptr.vmem [resolvable:$false] %s741_s4 }
  0x29   : > { %s743_s27 = scalar_lea.vmem %s742_s4, 512  ;;  %p744_p10 = scmp.lt.s32.totalorder %s172_s8, %s742_s4 }
  0x2a   : > { %p739_p4 = pnand %p737_p6, %p697_p2  ;;  %p745_p1 = scmp.lt.s32.totalorder %s743_s27, %s736_s16 }
  0x2c   : > { %p740_p7 = pneg %p739_p4  ;;  %p746_p13 = por %p745_p1, %p744_p10 }
  0x2e   : > { %p747_p3 = pnand %p746_p13, %p740_p7 }
  0x30   : > { %750 = shalt.err (!%p747_p3)
}
  0x31   : > { %600 = dma.hbm_to_vmem [thread:$0]  (!%p953_p0), %s170_s29, 256, %s172_s8, %s159_s15, %s846_s18, %s846_s18, %s847_s19  }
  0x32   : > { %183 = sbr.rel (%p974_p5) target bundleno = 1489 (0x5d1), region = 28  ;;  %s989_s25 = sand.u32 (!%p974_p5), 1, %s823_s10  }
  0x33   : > { %s992_s26 = sshll.u32 (!%p974_p5), %s989_s25, 4  ;;  %s186_s6 = scalar_lea.sflag (!%p974_p5), [#allocation5], %s989_s25 }
  0x34   : > { %s189_s20 = scalar_lea.vmem (!%p974_p5), [#allocation4], %s992_s26 }
  0x37   : > { %806 = dma.done.wait (%p922_p8), %s186_s6, 256  }
  0x38   : > { %808 = vsyncadd (%p922_p8), %s186_s6, 4294967040  ;;  %s195_s5 = scalar_lea.sflag [#allocation8], %s989_s25  ;;  %s198_s18 = scalar_lea.vmem [#allocation7], %s992_s26 }
  0x39   : > { %810 = dma.done.wait (%p922_p8), %s195_s5, 256  }
  0x3a   : > { %812 = vsyncadd (%p922_p8), %s195_s5, 4294967040  ;;  %v231_v0 = vlaneseq  ;;  %vm258_vm0 = vcmask 130048   ;;  %v849_v1 = vmov 0.0   ;;  %v1013_v4 = vld [vmem:[%s189_s20] sm:$0xff]  ;;  %v1015_v5 = vld [vmem:[%s189_s20 + $0x8] sm:$0xff]  ;;  %s850_s19 = smov 0.0  }
  0x3b   : > { %277 = vst.msk [vmem:[#allocation2] sm:$0xff] %vm258_vm0, %v849_v1  ;;  %278 = vst.msk [vmem:[#allocation2 + $0x8] sm:$0xff] %vm258_vm0, %v849_v1  ;;  %v229_v6 = vld [vmem:[%s198_s18] sm:$0xff]  ;;  %v230_v7 = vld [vmem:[%s198_s18 + $0x8] sm:$0xff]  ;;  %v256_v10 = vceil.f32 %v1013_v4  ;;  %v257_v11 = vceil.f32 %v1015_v5  ;;  %s851_s29 = smov 15.0   ;;  %s1042_s30 = scalar_lea.vmem [#allocation9], %s992_s26 }
  0x3c   : > { %v1010_v2 = vand.u32 127, %v231_v0  ;;  %279 = vst.msk [vmem:[#allocation3] sm:$0xff] %vm258_vm0, %v229_v6  ;;  %280 = vst.msk [vmem:[#allocation3 + $0x8] sm:$0xff] %vm258_vm0, %v230_v7 }
  0x3d   : > { %v259_v14 = vsel %vm258_vm0, %v256_v10, -inf  ;;  %v260_v15 = vsel %vm258_vm0, %v257_v11, -inf }
  0x3e   : > { %v233_v3 = vcvt.s32.f32 %v1010_v2  ;;  %v261_v16 = vmax.f32 %v259_v14, %v260_v15 }
  0x40   : > { %v234_v8 = vsub.f32 %v233_v3, %v1013_v4  ;;  %v235_v9 = vsub.f32 %v233_v3, %v1015_v5  ;;  %262 = vmax.xlane.f32.xlu0 %v261_v16 }
  0x42   : > { %v236_v12 = vfloor.f32 %v234_v8  ;;  %v237_v13 = vfloor.f32 %v235_v9 }
  0x44   : > { %v238_v17 = vsub.f32 %v234_v8, %v236_v12  ;;  %v239_v18 = vsub.f32 %v235_v9, %v237_v13  ;;  %v580_v19 = vtrunc.f32 %v236_v12  ;;  %v582_v20 = vtrunc.f32 %v237_v13 }
  0x46   : > { %v581_v21 = vcvt.f32.s32 %v580_v19  ;;  %v583_v22 = vcvt.f32.s32 %v582_v20  ;;  %v246_v23 = vsub.f32 1.0, %v238_v17  ;;  %v247_v24 = vsub.f32 1.0, %v239_v18 }
  0x48   : > { %v1026_v25 = vsub.s32 %v1010_v2, %v581_v21  ;;  %v1029_v26 = vsub.s32 %v1010_v2, %v583_v22  ;;  %vm244_vm1 = vcmp.ge.s32.totalorder %v581_v21, 0  ;;  %vm245_vm2 = vcmp.ge.s32.totalorder %v583_v22, 0 }
  0x49   : > { %v1031_v27 = vsel %vm244_vm1, %v246_v23, 0.0  ;;  %v1033_v28 = vsel %vm245_vm2, %v247_v24, 0.0  ;;  %v250_v29 = vadd.s32 1, %v581_v21  ;;  %v251_v30 = vadd.s32 1, %v583_v22 }
  0x4b   : > { %vm252_vm3 = vcmp.ge.s32.totalorder %v250_v29, 0  ;;  %vm253_vm4 = vcmp.ge.s32.totalorder %v251_v30, 0 }
  0x4c   : > { %v1035_v31 = vsel %vm252_vm3, %v238_v17, 0.0  ;;  %v1037_v32 = vsel %vm253_vm4, %v239_v18, 0.0 }
  0xc9   : > { %v263_v33 = vpop.xlane.xlu0 %262 }
  0xca   : > { %v264_v34 = vrot.slane %v263_v33, 4 }
  0xcc   : > { %v265_v35 = vmax.f32 %v263_v33, %v264_v34 }
  0xce   : > { %v266_v36 = vrot.slane %v265_v35, 2 }
  0xd0   : > { %v267_v37 = vmax.f32 %v265_v35, %v266_v36 }
  0xd2   : > { %v268_v38 = vrot.slane %v267_v37, 1 }
  0xd4   : > { %v269_v39 = vmax.f32 %v267_v37, %v268_v38 }
  0xd6   : > { %584 = vpush %v269_v39 }
 0x107   : > { %s585_s21 = spop %584 }
 0x108   : > { %s271_s28 = smax.f32 %s850_s19, %s585_s21 }
 0x109   : > { %s272_s3 = smin.f32 %s851_s29, %s271_s28 }
 0x10a   : > { %s273_s7 = sadd.f32 1.0, %s272_s3 }
 0x10c   : > { %s274_s8 = smul.f32 0.5, %s273_s7 }
 0x10e   : > { %s275_s15 = sceil.f32 %s274_s8 }
 0x10f   : > { %s1039_s16 = scvt.f32.s32 %s275_s15 }
 0x111   : > { %p568_p8 = scmp.le.s32.totalorder %s1039_s16, 0 }
 0x112   : > { %s1045_s4 = smov (!%p568_p8), 0  }
 0x113   : > { %510 = sbr.rel (%p568_p8) target bundleno = 985 (0x3d9), region = 87 }
 0x118 LB: >> { %v288_v40 = vld [vmem:[#allocation3] sm:$0xff]  ;;  %s852_s27 = smov 16   ;;  %v289_v41 = vld [vmem:[#allocation3 + $0x8] sm:$0xff]  ;;  %vm313_vm5 = vcmask 1047680   ;;  %s853_s26 = smov 113   ;;  %v301_v62 = vld [vmem:[#allocation2] sm:$0xff]  ;;  %s843_s4 = sphi %s1045_s4, %s284_s4  }
 0x119   : >> { %314 = vrot.lane.b32.xlu0 %v288_v40, %s852_s27  ;;  %s569_s6 = sshll.u32 %s843_s4, 1  ;;  %v302_v9 = vld [vmem:[#allocation2 + $0x8] sm:$0xff]  ;;  %s284_s4 = sadd.s32 1, %s843_s4  }
 0x11a   : >> { %s293_s20 = sadd.s32 1, %s569_s6  ;;  %v290_v50 = vstv %s569_s6  ;;  %s297_s5 = sadd.s32 2, %s569_s6 }
 0x11b   : >> { %v294_v51 = vstv %s293_s20  ;;  %vm291_vm6 = vcmp.eq.s32.totalorder %v1026_v25, %v290_v50  ;;  %v298_v52 = vstv %s297_s5  ;;  %vm292_vm8 = vcmp.eq.s32.totalorder %v1029_v26, %v290_v50  ;;  %p283_p0 = scmp.ge.s32.totalorder %s284_s4, %s1039_s16 }
 0x11c   : >> { %vm295_vm7 = vcmp.eq.s32.totalorder %v1026_v25, %v294_v51  ;;  %v303_v53 = vsel %vm291_vm6, %v1031_v27, 0.0  ;;  %vm296_vm9 = vcmp.eq.s32.totalorder %v1029_v26, %v294_v51  ;;  %vm299_vm10 = vcmp.eq.s32.totalorder %v1026_v25, %v298_v52 }
 0x11d   : >> { %317 = vrot.lane.b32.xlu0 %v289_v41, %s852_s27  ;;  %v305_v54 = vsel %vm295_vm7, %v1035_v31, 0.0  ;;  %v304_v56 = vsel %vm292_vm8, %v1033_v28, 0.0  ;;  %v306_v57 = vsel %vm296_vm9, %v1037_v32, 0.0  ;;  %v326_v58 = vsel %vm295_vm7, %v1031_v27, 0.0 }
 0x11e   : >> { %v307_v55 = vadd.f32 %v305_v54, %v303_v53  ;;  %v328_v59 = vsel %vm299_vm10, %v1035_v31, 0.0  ;;  %vm300_vm11 = vcmp.eq.s32.totalorder %v1029_v26, %v298_v52  ;;  %v308_v61 = vadd.f32 %v306_v57, %v304_v56 }
 0x11f   : >> { %v330_v63 = vadd.f32 %v328_v59, %v326_v58  ;;  %v327_v0 = vsel %vm296_vm9, %v1033_v28, 0.0  ;;  %v329_v3 = vsel %vm300_vm11, %v1037_v32, 0.0 }
 0x120   : >> { %v309_v60 = vmul.f32 %v307_v55, %v288_v40  ;;  %v310_v7 = vmul.f32 %v308_v61, %v289_v41  ;;  %v331_v11 = vadd.f32 %v329_v3, %v327_v0 }
 0x122   : >> { %v311_v6 = vadd.f32 %v309_v60, %v301_v62  ;;  %v312_v13 = vadd.f32 %v310_v7, %v302_v9 }
 0x18b   : >> { %v315_v42 = vpop.permute.xlu0 %314 }
 0x18c   : >> { %v316_v43 = vsel %vm313_vm5, %v315_v42, %v288_v40 }
 0x18d   : >> { %320 = vrot.lane.b32.xlu1 %v316_v43, %s852_s27 }
 0x18f   : >> { %v318_v44 = vpop.permute.xlu0 %317 }
 0x190   : >> { %v319_v45 = vsel %vm313_vm5, %v318_v44, %v289_v41 }
 0x191   : >> { %322 = vrot.lane.b32.xlu1 %v319_v45, %s852_s27 }
 0x1ff   : >> { %v321_v46 = vpop.permute.xlu1 %320 }
 0x200   : >> { %v324_v47 = vsel %vm313_vm5, %v321_v46, %v288_v40 }
 0x201   : >> { %334 = vrot.lane.b32.xlu0 %v324_v47, %s853_s26 }
 0x203   : >> { %v323_v48 = vpop.permute.xlu1 %322 }
 0x204   : >> { %v325_v49 = vsel %vm313_vm5, %v323_v48, %v289_v41 }
 0x205   : >> { %336 = vrot.lane.b32.xlu1 %v325_v49, %s853_s26 }
 0x273   : >> { %v335_v8 = vpop.permute.xlu0 %334 }
 0x274   : >> { %v340_v10 = vmul.f32 %v335_v8, %v330_v63  ;;  %346 = vrot.lane.b32.xlu0 %v335_v8, %s852_s27 }
 0x276   : >> { %v342_v12 = vadd.f32 %v340_v10, %v311_v6 }
 0x277   : >> { %v337_v14 = vpop.permute.xlu1 %336 }
 0x278   : >> { %344 = vst.msk [vmem:[#allocation2] sm:$0xff] %vm258_vm0, %v342_v12  ;;  %v341_v15 = vmul.f32 %v337_v14, %v331_v11  ;;  %349 = vrot.lane.b32.xlu1 %v337_v14, %s852_s27 }
 0x27a   : >> { %v343_v16 = vadd.f32 %v341_v15, %v312_v13 }
 0x27c   : >> { %345 = vst.msk [vmem:[#allocation2 + $0x8] sm:$0xff] %vm258_vm0, %v343_v16 }
 0x2e6   : >> { %v347_v17 = vpop.permute.xlu0 %346 }
 0x2e7   : >> { %v348_v18 = vsel %vm313_vm5, %v347_v17, %v335_v8 }
 0x2e8   : >> { %352 = vrot.lane.b32.xlu0 %v348_v18, %s852_s27 }
 0x2ea   : >> { %v350_v19 = vpop.permute.xlu1 %349 }
 0x2eb   : >> { %v351_v20 = vsel %vm313_vm5, %v350_v19, %v337_v14 }
 0x2ec   : >> { %354 = vrot.lane.b32.xlu1 %v351_v20, %s852_s27 }
 0x35a   : >> { %v353_v21 = vpop.permute.xlu0 %352 }
 0x35b   : >> { %v356_v22 = vsel %vm313_vm5, %v353_v21, %v335_v8 }
 0x35c   : >> { %360 = vrot.lane.b32.xlu0 %v356_v22, %s853_s26 }
 0x35e   : >> { %v355_v23 = vpop.permute.xlu1 %354 }
 0x35f   : >> { %v357_v24 = vsel %vm313_vm5, %v355_v23, %v337_v14 }
 0x360   : >> { %362 = vrot.lane.b32.xlu1 %v357_v24, %s853_s26 }
 0x3ce   : >> { %v361_v29 = vpop.permute.xlu0 %360 }
 0x3cf   : >> { %366 = vst.msk [vmem:[#allocation3] sm:$0xff] %vm258_vm0, %v361_v29 }
 0x3d2   : >> { %v363_v30 = vpop.permute.xlu1 %362 }
 0x3d3   : >> { %367 = vst.msk [vmem:[#allocation3 + $0x8] sm:$0xff] %vm258_vm0, %v363_v30 }
 0x3d4   : > { %286 = sbr.rel (!%p283_p0) target bundleno = 280 (0x118), region = 93 }
 0x3d9 PF: > { %v368_v33 = vld [vmem:[#allocation2] sm:$0xff]  ;;  %v369_v34 = vld [vmem:[#allocation2 + $0x8] sm:$0xff]  ;;  %s854_s18 = smov 16   ;;  %vm380_vm14 = vcmask 1047680   ;;  %s855_s21 = smov 14   ;;  %vm413_vm15 = vcmp.eq.s32.totalorder %v1010_v2, 0 }
 0x3da   : > { %v370_v35 = vsub.f32 %v368_v33, %v1013_v4  ;;  %v371_v36 = vsub.f32 %v369_v34, %v1015_v5  ;;  %s856_s19 = smov 113   ;;  %vm414_vm1 = vcmp.eq.s32.totalorder %v1010_v2, 15  ;;  %s579_s28 = sshll.u32 %s831_s12, 8 }
 0x3db   : > { %s436_s29 = sshll.u32 %s1042_s30, 4  ;;  %vm415_vm2 = vmor %vm413_vm15, %vm414_vm1  ;;  %s1104_s8 = scalar_lea.hbm %s1160_s2, %s579_s28  ;;  %s1106_s29 = int_to_ptr.vmem [resolvable:$true] %s436_s29 }
 0x3dc   : > { %v372_v37 = vand.u32 2147483647, %v370_v35  ;;  %v373_v38 = vand.u32 2147483647, %v371_v36  ;;  %s421_s12 = scalar_lea.sflag [#allocation6], %s989_s25  ;;  %s751_s15 = scalar_lea.vmem %s1106_s29, 256 }
 0x3dd   : > { %p752_p2 = scmp.ne.s32.totalorder %s1106_s29, %s751_s15  ;;  %s857_s16 = smov [#allocation9]  }
 0x3de   : > { %vm374_vm12 = vcmp.le.f32.partialorder %v372_v37, 1.0  ;;  %vm375_vm13 = vcmp.le.f32.partialorder %v373_v38, 1.0  ;;  %s755_s4 = sshll.u32 %s857_s16, 4  ;;  %s756_s4 = int_to_ptr.vmem [resolvable:$false] %s755_s4 }
 0x3df   : > { %v570_v39 = vsel %vm374_vm12, 1.0, %v849_v1  ;;  %v571_v40 = vsel %vm375_vm13, 1.0, %v849_v1  ;;  %p753_p5 = pnand %p752_p2, %p926_p9  ;;  %s757_s27 = scalar_lea.vmem %s756_s4, 512 }
 0x3e0   : > { %v675_v41 = vpack.i.bf16 %v571_v40, %v570_v39  ;;  %p758_p4 = scmp.lt.s32.totalorder %s1106_s29, %s756_s4  ;;  %p759_p7 = scmp.lt.s32.totalorder %s757_s27, %s751_s15 }
 0x3e1   : > { %p754_p6 = pneg %p753_p5 }
 0x3e2   : > { %676 = vrot.lane.b32.xlu0 %v675_v41, %s854_s18  ;;  %p760_p10 = por %p759_p7, %p758_p4 }
 0x3e4   : > { %p761_p1 = pnand %p760_p10, %p754_p6 }
 0x454   : > { %v677_v42 = vpop.permute.xlu0 %676 }
 0x455   : > { %v679_v25 = vunpack.i.h.bf16 %v677_v42  ;;  %v678_v26 = vunpack.i.l.bf16 %v677_v42 }
 0x457   : > { %v383_v27 = vsel %vm380_vm14, %v678_v26, %v570_v39  ;;  %v386_v28 = vsel %vm380_vm14, %v679_v25, %v571_v40 }
 0x458   : > { %v680_v4 = vpack.i.bf16 %v386_v28, %v383_v27 }
 0x45a   : > { %681 = vrot.lane.b32.xlu0 %v680_v4, %s854_s18 }
 0x4cc   : > { %v682_v5 = vpop.permute.xlu0 %681 }
 0x4cd   : > { %v684_v31 = vunpack.i.h.bf16 %v682_v5  ;;  %v683_v32 = vunpack.i.l.bf16 %v682_v5 }
 0x4cf   : > { %v391_v43 = vsel %vm380_vm14, %v683_v32, %v570_v39  ;;  %v392_v44 = vsel %vm380_vm14, %v684_v31, %v571_v40 }
 0x4d0   : > { %v685_v45 = vpack.i.bf16 %v392_v44, %v391_v43 }
 0x4d2   : > { %686 = vrot.lane.b32.xlu1 %v685_v45, %s855_s21 }
 0x544   : > { %v687_v1 = vpop.permute.xlu1 %686 }
 0x545   : > { %v689_v46 = vunpack.i.h.bf16 %v687_v1  ;;  %v688_v47 = vunpack.i.l.bf16 %v687_v1 }
 0x547   : > { %v402_v48 = vmax.f32 %v392_v44, %v689_v46  ;;  %v401_v49 = vmax.f32 %v391_v43, %v688_v47 }
 0x549   : > { %v690_v50 = vpack.i.bf16 %v402_v48, %v401_v49 }
 0x54b   : > { %691 = vrot.lane.b32.xlu1 %v690_v50, %s856_s19 }
 0x5bd   : > { %v692_v51 = vpop.permute.xlu1 %691 }
 0x5be   : > { %v694_v52 = vunpack.i.h.bf16 %v692_v51  ;;  %v693_v53 = vunpack.i.l.bf16 %v692_v51 }
 0x5c0   : > { %v412_v54 = vmax.f32 %v571_v40, %v694_v52  ;;  %v411_v55 = vmax.f32 %v570_v39, %v693_v53 }
 0x5c2   : > { %v417_v2 = vsel %vm415_vm2, 1.0, %v412_v54  ;;  %v416_v56 = vsel %vm415_vm2, 1.0, %v411_v55 }
 0x5c3   : > { %419 = vst.msk [vmem:[%s1042_s30 + $0x8] sm:$0xff] %vm258_vm0, %v417_v2  ;;  %418 = vst.msk [vmem:[%s1042_s30] sm:$0xff] %vm258_vm0, %v416_v56 }
 0x5c4   : > { %764 = shalt.err (!%p761_p1)
}
 0x5c5   : > { %s765_s30 = scalar_lea.hbm %s1104_s8, 256  ;;  %s769_s20 = scalar_lea.hbm %s1160_s2, 512 }
 0x5c6   : > { %p766_p13 = scmp.ne.s32.totalorder %s1104_s8, %s765_s30  ;;  %p770_p0 = scmp.lt.s32.totalorder %s1104_s8, %s1160_s2 }
 0x5c7   : > { %p771_p2 = scmp.lt.s32.totalorder %s769_s20, %s765_s30 }
 0x5c8   : > { %p767_p3 = pnand %p766_p13, %p926_p9 }
 0x5c9   : > { %p772_p5 = por %p771_p2, %p770_p0 }
 0x5ca   : > { %p768_p8 = pneg %p767_p3 }
 0x5cc   : > { %p773_p6 = pnand %p772_p5, %p768_p8 }
 0x5ce   : > { %776 = shalt.err (!%p773_p6)
}
 0x5cf   : > { %s858_s21 = smov 128   ;;  %s859_s19 = smov 8  }
 0x5d0   : > { %592 = dma.vmem_to_hbm [thread:$0]  (%p926_p9), %s1106_s29, 256, %s1104_s8, %s421_s12, %s858_s21, %s858_s21, %s859_s19  }
 0x5d1 PF: > { %s451_s28 = sand.u32 1, %s819_s9   ;;  %p602_p4 = pnand %p557_p12, %p933_p11 }
 0x5d2   : > { %s452_s3 = scalar_lea.sflag [#allocation6], %s451_s28 }
 0x5d3   : > { %p603_p7 = pneg %p602_p4 }
 0x5d5   : > { %814 = dma.done.wait (%p603_p7), %s452_s3, 256  }
 0x5d6   : > { %816 = vsyncadd (%p603_p7), %s452_s3, 4294967040  ;;  %s21_s14 = sadd.s32 1, %s839_s14   ;;  %s1167_s9 = smov %s823_s10 }
 0x5d7   : > { %p18_p10 = scmp.ge.s32.totalorder %s21_s14, 4   ;;  %s1168_s10 = smov %s827_s11 }
 0x5d8   : > { %s1169_s11 = smov %s931_s23  ;;  %s1170_s12 = smov %s835_s13 }
 0x5d9   : > { %s1171_s13 = smov %s1173_s17  ;;  %20 = sbr.rel (!%p18_p10) target bundleno = 8 (0x8), region = 104 }
 0x5de   :  { %457 = vsyncpa [#allocation5], 1 }
 0x5df   :  { %459 = vsyncpa [#allocation5 + $0x1], 1 }
 0x5e0   :  { %460 = vsyncpa [#allocation8], 1 }
 0x5e1   :  { %462 = vsyncpa [#allocation8 + $0x1], 1 }
 0x5e2   :  { %463 = vsyncpa [#allocation6], 1 }
 0x5e3   :  { %465 = vsyncpa [#allocation6 + $0x1], 1 }

</bundles_post_ra>
